<compile_context>
chip_gen: v5e
topology: v5e:2x2
jax: 0.10.0
libtpu: 0.0.40
codegen_flags: <defaults>
</compile_context>

<pallas_src>
import functools

import jax
import jax.numpy as jnp
from jax.experimental import pallas as pl
from jax.experimental.pallas import tpu as pltpu


# --------------------------------------------------------------------------- #
# Stage 1: class prototypes  protos[c] = mean over shots of class c           #
# --------------------------------------------------------------------------- #
def _proto_kernel(xg_ref, proto_ref):
    # xg_ref block: (1, n_shots, D) -- one class per grid step.
    c = pl.program_id(0)
    shots = xg_ref[0].astype(jnp.float32)                      # (n_shots, D)
    mean = jnp.mean(shots, axis=0, keepdims=True)              # (1, D)
    proto_ref[pl.ds(c, 1), :] = mean.astype(proto_ref.dtype)   # row c of resident (K, D)


# --------------------------------------------------------------------------- #
# Stage 2: distances + cross entropy + accuracy, tiled over rows of the batch #
# --------------------------------------------------------------------------- #
def _pn_main_kernel(protos_ref, x_ref, out_ref, acc_ref, *,
                    n_ways, n_shots, n_total, tile_n, use_mxu):
    i = pl.program_id(0)
    last = pl.num_programs(0) - 1
    k = n_ways

    @pl.when(i == 0)
    def _init():
        acc_ref[0] = 0.0        # running sum of per-row cross entropy
        acc_ref[1] = 0.0        # running count of correct argmax predictions

    x = x_ref[...].astype(jnp.float32)                         # (TN, D)
    protos = protos_ref[...].astype(jnp.float32)               # (K, D)

    col = jax.lax.broadcasted_iota(jnp.int32, (tile_n, k), 1)              # class id per column
    row = jax.lax.broadcasted_iota(jnp.int32, (tile_n, 1), 0) + i * tile_n  # global sample index
    valid = row < n_total                                       # mask for padded rows of the last tile
    label = row // n_shots                                      # episodic labels (targets ignored by module)

    if use_mxu:
        # Quadratic form on the MXU (only for large K*D, where a K-way VPU loop
        # would spill / the matmul is not mostly padding).  Clamp >= 0: the
        # x^2 + p^2 - 2xp form can go slightly negative from cancellation.
        g = jax.lax.dot_general(x, protos, (((1,), (1,)), ((), ())),
                                preferred_element_type=jnp.float32)        # (TN, K)
        x2 = jnp.sum(x * x, axis=1, keepdims=True)                          # (TN, 1)
        p2 = jnp.sum(protos * protos, axis=1)[None, :]                      # (1, K)
        sq = jnp.maximum(x2 + p2 - 2.0 * g, 0.0)
    else:
        # Direct VPU form: squared distance per class, accumulated lane-dense
        # into (TN, K) with a masked add (no 1-lane concatenate, temporaries
        # die every iteration so live ranges stay bounded).
        sq = jnp.zeros((tile_n, k), jnp.float32)
        for c in range(k):
            diff = x - protos[c:c + 1, :]                                   # (TN, D)
            sq_c = jnp.sum(diff * diff, axis=1, keepdims=True)              # (TN, 1)
            sq = sq + jnp.where(col == c, sq_c, 0.0)

    # TODO(synk): if the repo's pair_euclidean_distances returns *squared*
    # distances (protonet-style), use `logits = -sq` here; accuracy below is
    # unaffected because it already works on sq directly.
    logits = -jnp.sqrt(sq)                                                   # (TN, K)

    # ---- cross entropy (sum of per-row terms; mean taken at finalize) ----
    onehot = (col == label).astype(jnp.float32)                             # (TN, K)
    m = jnp.max(logits, axis=1, keepdims=True)
    lse = m + jnp.log(jnp.sum(jnp.exp(logits - m), axis=1, keepdims=True))
    picked = jnp.sum(logits * onehot, axis=1, keepdims=True)
    ce_rows = jnp.where(valid, lse - picked, 0.0)                            # (TN, 1)

    # ---- accuracy: first-index argmin over squared distances (no sqrt) ----
    minv = jnp.min(sq, axis=1, keepdims=True)
    est = jnp.min(jnp.where(sq == minv, col, k), axis=1, keepdims=True)      # (TN, 1) int32
    hits = jnp.where(jnp.logical_and(valid, est == label), 1.0, 0.0)

    acc_ref[0] += jnp.sum(ce_rows)
    acc_ref[1] += jnp.sum(hits)

    @pl.when(i == last)
    def _fin():
        inv_n = 1.0 / n_total
        out_ref[0] = acc_ref[0] * inv_n      # mean cross entropy (w applied in wrapper)
        out_ref[1] = acc_ref[1] * inv_n      # accuracy


# --------------------------------------------------------------------------- #
# Wrapper mirroring PNLoss.forward -> (loss * w, acc, 0.0, 0.0)               #
# --------------------------------------------------------------------------- #
def pn_loss(inputs, targets=None, *, num_instances=8, w=1.0, max_rows_per_tile=512):
    """`targets` is accepted for API parity but (as in the PyTorch module) unused."""
    del targets  # PNLoss derives labels from the episodic layout, not from targets.
    n, d = inputs.shape
    n_shots = int(num_instances)
    if n % n_shots != 0:
        raise ValueError(f"batch size {n} must be divisible by num_instances {n_shots}")
    n_ways = n // n_shots

    # ---- stage 1: prototypes (K, D), gridded over classes ----
    x3 = inputs.reshape(n_ways, n_shots, d)
    protos = pl.pallas_call(
        _proto_kernel,
        out_shape=jax.ShapeDtypeStruct((n_ways, d), jnp.float32),
        grid=(n_ways,),
        in_specs=[pl.BlockSpec((1, n_shots, d), lambda c: (c, 0, 0))],
        out_specs=pl.BlockSpec((n_ways, d), lambda c: (0, 0)),   # resident; row c written per step
        compiler_params=pltpu.CompilerParams(dimension_semantics=("arbitrary",)),
    )(x3)

    # ---- stage 2: row-tiled distance / CE / accuracy pass ----
    # Tile budget: <= ~4 MiB per row-tile buffer (x2 for double buffering) so the
    # kernel fits the default scoped VMEM on v5e (16 MiB) and v7x's 64 MiB physical.
    bytes_per_row = d * 4
    cap = min(int(max_rows_per_tile), max(8, (4 * 1024 * 1024) // bytes_per_row))
    cap = max(8, (cap // 8) * 8)                 # keep sublane alignment (multiple of 8)
    tile_n = n if n <= cap else cap              # single full block when the episode is small
    num_tiles = pl.cdiv(n, tile_n)
    # MXU quadratic form only when the matmul isn't mostly padding / the class
    # loop would get long; otherwise the direct VPU masked-add form wins.
    use_mxu = (n_ways > 32) or (d >= 256)

    kernel = functools.partial(_pn_main_kernel, n_ways=n_ways, n_shots=n_shots,
                               n_total=n, tile_n=tile_n, use_mxu=use_mxu)

    out = pl.pallas_call(
        kernel,
        out_shape=jax.ShapeDtypeStruct((2,), jnp.float32),      # [mean CE, accuracy]
        grid=(num_tiles,),
        in_specs=[pl.BlockSpec((n_ways, d), lambda i: (0, 0)),  # protos: resident, tiny
                  pl.BlockSpec((tile_n, d), lambda i: (i, 0))], # batch rows: pipelined tiles
        out_specs=pl.BlockSpec((2,), lambda i: (0,),
                               memory_space=pltpu.MemorySpace.SMEM),
        scratch_shapes=[pltpu.SMEM((2,), jnp.float32)],
        compiler_params=pltpu.CompilerParams(
            dimension_semantics=("arbitrary",),                 # scratch carries across tiles
            vmem_limit_bytes=32 * 1024 * 1024),
        cost_estimate=pl.CostEstimate(
            flops=3 * n * n_ways * d + 12 * n * n_ways,
            transcendentals=2 * n * n_ways,
            bytes_accessed=4 * (n * d + n_ways * d + 2)),
    )(protos, inputs)

    # Apply w outside the kernel so a different w never forces a recompile.
    return w * out[0], out[1], 0.0, 0.0


if __name__ == "__main__":
    key = jax.random.PRNGKey(0)
    k_x, k_t, k_c = jax.random.split(key, 3)

    # Pure-JAX reference for PNLoss.forward.
    def ref(x, n_shots, w):
        n, d = x.shape
        k = n // n_shots
        protos = jnp.mean(x.reshape(k, n_shots, d), axis=1)
        dist = jnp.sqrt(jnp.sum((x[:, None, :] - protos[None, :, :]) ** 2, axis=-1))
        logits = -dist
        labels = jnp.repeat(jnp.arange(k), n_shots)
        lse = jax.nn.logsumexp(logits, axis=1)
        picked = jnp.take_along_axis(logits, labels[:, None], axis=1)[:, 0]
        loss = w * jnp.mean(lse - picked)
        acc = jnp.mean((jnp.argmax(logits, axis=1) == labels).astype(jnp.float32))
        return loss, acc

    # (a) module-default episode: 4 ways x 8 shots, D=32  -> single-tile grid.
    num_instances, n_ways, embed_dim, w = 8, 4, 32, 0.5
    batch = n_ways * num_instances
    x = jax.random.normal(k_x, (batch, embed_dim), dtype=jnp.float32)
    targets = jax.random.randint(k_t, (batch,), 0, n_ways, dtype=jnp.int32)  # unused by PNLoss

    loss, acc, _, _ = pn_loss(x, targets, num_instances=num_instances, w=w)
    jax.block_until_ready(loss)
    exp_loss, exp_acc = ref(x, num_instances, w)
    assert jnp.allclose(loss, exp_loss, rtol=1e-5, atol=1e-5), (loss, exp_loss)
    assert jnp.allclose(acc, exp_acc, rtol=1e-6, atol=1e-6), (acc, exp_acc)

    # (b) same data through the multi-tile accumulation path (4 row tiles of 8).
    loss_b, acc_b, _, _ = pn_loss(x, targets, num_instances=num_instances, w=w,
                                  max_rows_per_tile=8)
    assert jnp.allclose(loss_b, exp_loss, rtol=1e-5, atol=1e-5), (loss_b, exp_loss)
    assert jnp.allclose(acc_b, exp_acc, rtol=1e-6, atol=1e-6), (acc_b, exp_acc)

    # (c) batch not divisible by the row tile -> masked last tile (5 ways x 5 shots).
    x_c = jax.random.normal(k_c, (25, embed_dim), dtype=jnp.float32)
    loss_c, acc_c, _, _ = pn_loss(x_c, None, num_instances=5, w=1.0,
                                  max_rows_per_tile=16)
    exp_loss_c, exp_acc_c = ref(x_c, 5, 1.0)
    assert jnp.allclose(loss_c, exp_loss_c, rtol=1e-5, atol=1e-5), (loss_c, exp_loss_c)
    assert jnp.allclose(acc_c, exp_acc_c, rtol=1e-6, atol=1e-6), (acc_c, exp_acc_c)

    print("KERNEL_OK")
</pallas_src>

<mosaic_0001>
module attributes {stable_mosaic.version = 11 : i64} {
  func.func @_proto_kernel(%arg0: i32, %arg1: memref<1x8x32xf32, #tpu.memory_space<vmem>>, %arg2: memref<4x32xf32, #tpu.memory_space<vmem>>) attributes {dimension_semantics = [#tpu.dimension_semantics<arbitrary>], iteration_bounds = array<i64: 4>, scalar_prefetch = 0 : i64, scratch_operands = 0 : i64, tpu.core_type = #tpu.core_type<tc>, window_params = [{transform_indices = @transform_0, window_bounds = array<i64: 1, 8, 32>}, {pipeline_mode = #tpu.pipeline_mode<synchronous>, transform_indices = @transform_1, window_bounds = array<i64: 4, 32>}]} {
    %c0 = arith.constant 0 : index
    %c0_0 = arith.constant 0 : index
    %c0_1 = arith.constant 0 : index
    %0 = vector.load %arg1[%c0, %c0_0, %c0_1] : memref<1x8x32xf32, #tpu.memory_space<vmem>>, vector<1x8x32xf32>
    %1 = vector.shape_cast %0 : vector<1x8x32xf32> to vector<8x32xf32>
    %cst = arith.constant dense<0.000000e+00> : vector<32xf32>
    %2 = vector.multi_reduction <add>, %1, %cst [0] : vector<8x32xf32> to vector<32xf32>
    %3 = vector.shape_cast %2 : vector<32xf32> to vector<1x32xf32>
    %cst_2 = arith.constant 8.000000e+00 : f32
    %4 = vector.broadcast %cst_2 : f32 to vector<1x32xf32>
    %5 = arith.divf %3, %4 : vector<1x32xf32>
    %6 = arith.index_cast %arg0 : i32 to index
    %c0_3 = arith.constant 0 : index
    %7 = vector.load %arg2[%6, %c0_3] : memref<4x32xf32, #tpu.memory_space<vmem>>, vector<1x32xf32>
    tpu.vector_store %arg2[%6, %c0_3], %5 {strides = array<i32>} : memref<4x32xf32, #tpu.memory_space<vmem>>, vector<1x32xf32>,
    return
  }
  func.func @transform_0(%arg0: i32) -> (i32, i32, i32) {
    %c0_i32 = arith.constant 0 : i32
    %c0_i32_0 = arith.constant 0 : i32
    %c0_i32_1 = arith.constant 0 : i32
    return %arg0, %c0_i32, %c0_i32_0 : i32, i32, i32
  }
  func.func @transform_1(%arg0: i32) -> (i32, i32) {
    %c0_i32 = arith.constant 0 : i32
    %c0_i32_0 = arith.constant 0 : i32
    %c0_i32_1 = arith.constant 0 : i32
    return %c0_i32, %c0_i32_0 : i32, i32
  }
}

</mosaic_0001>

<bundles_post_ra>
// kernel: tpu_custom_call.1
= control target key start
LH: loop header
LB: loop body
LE: loop exit
PB: predicated region body
PF: predicated region fallthrough
CT: control target
= control target key end

     0   :  { %6 = vsyncpa [#allocation3], 0  ;;  %s470_s0 = inlined_call_operand.hbm [shape: f32[4,8,32], index: 0, kind: input, shape index: {}]   ;;  %s471_s1 = inlined_call_operand.hbm [shape: f32[4,32], index: 1, kind: output, shape index: {}]  }
   0x1   :  { %8 = vsyncpa [#allocation3 + $0x1], 0 }
   0x2   :  { %9 = vsyncpa [#allocation4], 0  ;;  %s376_s6 = smov 0   ;;  %s378_s7 = smov 0  }
   0x3   :  { %s380_s8 = smov 0   ;;  %s382_s9 = smov 0  }
   0x4 LB: > { %s202_s10 = sadd.s32 4294967295, %s362_s9   ;;  %s396_s11 = sadd.s32 1, %s362_s9   ;;  %s362_s9 = sphi %s382_s9, %s478_s9   ;;  %s358_s8 = sphi %s380_s8, %s477_s8   ;;  %s354_s7 = sphi %s378_s7, %s476_s7   ;;  %s350_s6 = sphi %s376_s6, %s475_s6  }
   0x5   : > { %s19_s12 = ssub.s32 %s362_s9, %s396_s11  ;;  %s22_s13 = sadd.s32 1, %s358_s8 }
   0x6   : > { %p20_p0 = scmp.eq.s32.totalorder %s19_s12, 0  ;;  %p29_p1 = scmp.ne.s32.totalorder %s358_s8, %s354_s7 }
   0x7   : > { %p30_p2 = scmp.eq.s32.totalorder %s362_s9, 0  ;;  %p35_p3 = scmp.ne.s32.totalorder %s354_s7, %s350_s6 }
   0x8   : > { %s406_s14 = scalar_select %p20_p0, %s358_s8, %s22_s13  }
   0x9   : > { %p408_p4 = por %p30_p2, %p29_p1  ;;  %p36_p5 = scmp.eq.s32.totalorder %s202_s10, 0 }
   0xa   : > { %p227_p6 = scmp.lt.s32.totalorder %s362_s9, 4  ;;  %s80_s17 = sand.u32 1, %s358_s8  }
   0xb   : > { %p415_p7 = por %p36_p5, %p35_p3  ;;  %s205_s18 = sshll.u32 %s80_s17, 3 }
   0xc   : > { %s206_s19 = sshll.u32 %s362_s9, 3  ;;  %s84_s23 = scalar_lea.vmem [#allocation2], %s205_s18 }
   0xd   : > { %s88_s22 = scalar_lea.hbm %s470_s0, %s206_s19  ;;  %s92_s24 = sshll.u32 %s84_s23, 4  ;;  %s93_s24 = int_to_ptr.vmem [resolvable:$true] %s92_s24 }
   0xe   : > { %s90_s25 = sshll.u32 %s88_s22, 4  ;;  %p426_p8 = pnand %p227_p6, %p408_p4  ;;  %s91_s25 = int_to_ptr.hbm [resolvable:$true] %s90_s25 }
   0xf   : > { %p207_p9 = scmp.ge.s32.totalorder %s362_s9, 1  ;;  %p97_p10 = scmp.lt.s32.totalorder %s362_s9, 5 }
  0x10   : > { %s81_s27 = scalar_lea.sflag [#allocation3], %s80_s17  ;;  %s266_s28 = sshra.s32 %s91_s25, 4  ;;  %s267_s28 = int_to_ptr.hbm [resolvable:$true] %s266_s28 }
  0x11   : > { %s268_s29 = scalar_lea.hbm %s267_s28, 8  ;;  %p270_p12 = pneg %p426_p8 }
  0x12   : > { %p269_p11 = scmp.ne.s32.totalorder %s267_s28, %s268_s29  ;;  %s273_s3 = scalar_lea.hbm %s470_s0, 32 }
  0x13   : > { %p274_p1 = scmp.lt.s32.totalorder %s267_s28, %s470_s0  ;;  %p275_p2 = scmp.lt.s32.totalorder %s273_s3, %s268_s29 }
  0x14   : > { %p271_p13 = pnand %p270_p12, %p269_p11 }
  0x15   : > { %p276_p3 = por %p275_p2, %p274_p1 }
  0x16   : > { %p272_p0 = pneg %p271_p13 }
  0x18   : > { %p277_p4 = pnand %p276_p3, %p272_p0 }
  0x1a   : > { %280 = shalt.err (!%p277_p4)
}
  0x1b   : > { %226 = dma.hbm_to_vmem [thread:$0]  (!%p426_p8), %s91_s25, 128, %s93_s24, %s81_s27  }
  0x1c   : > { %p98_p5 = pnand %p207_p9, %p97_p10 }
  0x1d   : > { %s103_s6 = sand.u32 (!%p98_p5), 1, %s354_s7  }
  0x1e   : > { %101 = sbr.rel (%p98_p5) target bundleno = 59 (0x3b), region = 24  ;;  %s208_s12 = sshll.u32 (!%p98_p5), %s103_s6, 3 }
  0x1f   : > { %s104_s13 = scalar_lea.sflag (!%p98_p5), [#allocation3], %s103_s6  ;;  %s107_s15 = scalar_lea.vmem (!%p98_p5), [#allocation2], %s208_s12 }
  0x23   : > { %341 = dma.done.wait (%p415_p7), %s104_s13, 128  }
  0x24   : > { %343 = vsyncadd (%p415_p7), %s104_s13, 4294967168  ;;  %v364_v0 = vmov 8.0   ;;  %vm123_vm0 = vcmask 261120   ;;  %v122_v2 = vld [vmem:[%s107_s15] sm:$0xff]  ;;  %s365_s16 = smov [#allocation5]   ;;  %s150_s20 = sshll.u32 %s471_s1, 4  ;;  %s151_s20 = int_to_ptr.hbm [resolvable:$true] %s150_s20 }
  0x25   : > { %264 = vrcp.f32 %v364_v0  ;;  %v124_v3 = vsel %vm123_vm0, %v122_v2, 0.0  ;;  %s148_s17 = sshll.u32 %s365_s16, 4  ;;  %vm140_vm2 = vcmask 253952   ;;  %p228_p6 = scmp.eq.s32.totalorder %s202_s10, 3  ;;  %s149_s17 = int_to_ptr.vmem [resolvable:$true] %s148_s17 }
  0x26   : > { %v125_v5 = vrot.slane %v124_v3, 4  ;;  %s214_s21 = scalar_lea.vmem [#allocation5], %s362_s9 }
  0x28   : > { %v126_v7 = vadd.f32 %v125_v5, %v124_v3 }
  0x2a   : > { %v127_v9 = vrot.slane %v126_v7, 2 }
  0x2b   : > { %v265_v1 = vpop.eup %264 }
  0x2c   : > { %v132_v4 = vmul.f32 8.0, %v265_v1  ;;  %v128_v11 = vadd.f32 %v127_v9, %v126_v7  ;;  %vm136_vm1 = vweird.f32 %v265_v1 }
  0x2e   : > { %v133_v6 = vsub.f32 1.0, %v132_v4  ;;  %v129_v12 = vrot.slane %v128_v11, 1 }
  0x30   : > { %v134_v8 = vmul.f32 %v265_v1, %v133_v6  ;;  %v130_v14 = vadd.f32 %v129_v12, %v128_v11 }
  0x32   : > { %v135_v10 = vadd.f32 %v265_v1, %v134_v8 }
  0x34   : > { %v137_v13 = vsel %vm136_vm1, %v265_v1, %v135_v10 }
  0x35   : > { %v138_v15 = vmul.f32 %v137_v13, %v130_v14 }
  0x37   : > { %216 = vst.msk [vmem:[%s214_s21 - $0x1] sm:$0x1] %vm140_vm2, %v138_v15 }
  0x38   : > { %220 = dma.vmem_to_hbm [thread:$0]  (%p228_p6), %s149_s17, 64, %s151_s20, [#allocation4]  }
  0x39   : > { %345 = dma.done.wait (%p228_p6), [#allocation4], 64  }
  0x3a   : > { %347 = vsyncadd (%p228_p6), [#allocation4], 4294967232 }
  0x3b PF: > { %p12_p7 = scmp.ge.s32.totalorder %s396_s11, 6   ;;  %s475_s6 = smov %s354_s7 }
  0x3c   : > { %s476_s7 = smov %s358_s8  ;;  %s477_s8 = smov %s406_s14 }
  0x3d   : > { %s478_s9 = smov %s396_s11  ;;  %14 = sbr.rel (!%p12_p7) target bundleno = 4 (0x4), region = 62 }
  0x42   :  { %164 = vsyncpa [#allocation3], 1 }
  0x43   :  { %166 = vsyncpa [#allocation3 + $0x1], 1 }
  0x44   :  { %167 = vsyncpa [#allocation4], 1 }
  0x45   :  { %169 = vsyncpa [#allocation4 + $0x1], 1 }

</bundles_post_ra>
